<compile_context>
chip_gen: v6e
topology: v6e:2x2x1
jax: 0.10.0
libtpu: 0.0.40
codegen_flags: <defaults>
</compile_context>

<pallas_src>
import functools

import jax
import jax.numpy as jnp
from jax import lax
from jax.experimental import pallas as pl
from jax.experimental.pallas import tpu as pltpu


def attention_block_kernel(x_ref, wqkv_ref, bqkv_ref, wout_ref, bout_ref,
                           gamma_ref, beta_ref, o_ref, *,
                           batch, seq, num_heads, eps):
    M, E = x_ref.shape                      # M = batch * seq
    hd = E // num_heads

    x = x_ref[...].astype(jnp.float32)      # (M, E)

    # ---- fused in-projection on the whole (B*S, E) slab (one MXU matmul) ----
    # wqkv_ref is pre-transposed to (E, 3E); Q columns are pre-scaled by
    # 1/sqrt(head_dim) in the wrapper, so no per-step scale multiply here.
    qkv = jnp.dot(x, wqkv_ref[...].astype(jnp.float32),
                  preferred_element_type=jnp.float32)
    qkv = qkv + bqkv_ref[...].astype(jnp.float32)           # (M, 3E)
    qkv3 = qkv.reshape(batch, seq, 3 * E)                    # (B, S, 3E)

    wout_t = wout_ref[...].astype(jnp.float32)               # (E, E) pre-transposed

    # ---- per-head attention, batched over B via single-batch-dim einsums ----
    # Out-projection is folded per head and accumulated => no concatenate.
    attn = jnp.zeros((M, E), jnp.float32)
    for h in range(num_heads):                               # static unroll (H small)
        q = qkv3[:, :, h * hd:(h + 1) * hd]                  # (B, S, hd)
        k = qkv3[:, :, E + h * hd:E + (h + 1) * hd]          # (B, S, hd)
        v = qkv3[:, :, 2 * E + h * hd:2 * E + (h + 1) * hd]  # (B, S, hd)

        s = jnp.einsum('bqd,bkd->bqk', q, k,
                       preferred_element_type=jnp.float32)   # (B, S, S)
        s = s - jnp.max(s, axis=-1, keepdims=True)
        p = jnp.exp(s)
        p = p * pl.reciprocal(jnp.sum(p, axis=-1, keepdims=True), approx=True)

        ctx = jnp.einsum('bqk,bkd->bqd', p, v,
                         preferred_element_type=jnp.float32)  # (B, S, hd)
        attn = attn + jnp.dot(ctx.reshape(M, hd),
                              wout_t[h * hd:(h + 1) * hd, :],
                              preferred_element_type=jnp.float32)

    attn = attn + bout_ref[...].astype(jnp.float32)

    # ---- residual + LayerNorm over the embedding dim ----
    # TODO(synk): dropout on attn_output omitted (identity in eval mode).
    y = x + attn
    mean = jnp.mean(y, axis=-1, keepdims=True)
    c = y - mean
    var = jnp.mean(c * c, axis=-1, keepdims=True)
    y = c * lax.rsqrt(var + eps)
    y = y * gamma_ref[...].astype(jnp.float32) + beta_ref[...].astype(jnp.float32)

    o_ref[...] = y.astype(o_ref.dtype)


def attention_block(x, wqkv, bqkv, wout, bout, gamma, beta, *,
                    num_heads, eps=1e-5):
    """x: (B, S, E); parameters in PyTorch nn.MultiheadAttention / LayerNorm layout."""
    B, S, E = x.shape
    hd = E // num_heads
    scale = 1.0 / float(hd) ** 0.5

    # Trace-time parameter prep (done once, outside the kernel):
    #  - transpose weights so the kernel contracts on dim 0 (no in-kernel .T)
    #  - fold the 1/sqrt(head_dim) Q scale into the in-projection weight/bias.
    col_scale = jnp.concatenate([jnp.full((E,), scale, dtype=x.dtype),
                                 jnp.ones((2 * E,), dtype=x.dtype)])
    wqkv_t = wqkv.T * col_scale[None, :]                     # (E, 3E)
    bqkv_s = (bqkv.reshape(1, 3 * E) * col_scale[None, :])   # (1, 3E)
    wout_t = wout.T                                          # (E, E)
    bout2 = bout.reshape(1, E)
    gamma2 = gamma.reshape(1, E)
    beta2 = beta.reshape(1, E)

    x2 = x.reshape(B * S, E)                                 # fold B into M

    kernel = functools.partial(attention_block_kernel,
                               batch=B, seq=S, num_heads=num_heads, eps=eps)

    # Single kernel invocation (no grid): every operand fits comfortably in
    # VMEM at these sizes, and a size-1 pipeline avoids per-step overhead.
    y2 = pl.pallas_call(
        kernel,
        out_shape=jax.ShapeDtypeStruct((B * S, E), x.dtype),
        compiler_params=pltpu.CompilerParams(vmem_limit_bytes=16 * 1024 * 1024),
    )(x2, wqkv_t, bqkv_s, wout_t, bout2, gamma2, beta2)

    return y2.reshape(B, S, E)


if __name__ == "__main__":
    # Small shapes consistent with the module: batch=2, seq=8, embed_dim=32, heads=4.
    B, S, E, H = 2, 8, 32, 4

    key = jax.random.PRNGKey(0)
    kx, kqkv, kbqkv, kwo, kbo = jax.random.split(key, 5)

    x = jax.random.normal(kx, (B, S, E), dtype=jnp.float32)

    # Deterministic synthetic parameters, in PyTorch layouts:
    wqkv = 0.05 * jax.random.normal(kqkv, (3 * E, E), dtype=jnp.float32)   # in_proj_weight
    bqkv = 0.05 * jax.random.normal(kbqkv, (3 * E,), dtype=jnp.float32)    # in_proj_bias
    wout = 0.05 * jax.random.normal(kwo, (E, E), dtype=jnp.float32)        # out_proj.weight
    bout = 0.05 * jax.random.normal(kbo, (E,), dtype=jnp.float32)          # out_proj.bias
    gamma = jnp.ones((E,), dtype=jnp.float32)                              # norm1.weight
    beta = jnp.zeros((E,), dtype=jnp.float32)                              # norm1.bias

    out = attention_block(x, wqkv, bqkv, wout, bout, gamma, beta, num_heads=H)
    jax.block_until_ready(out)
    assert out.shape == (B, S, E)
    print("KERNEL_OK")
</pallas_src>

<mosaic_0001>
module attributes {stable_mosaic.version = 11 : i64} {
  func.func @attention_block_kernel(%arg0: memref<16x32xf32, #tpu.memory_space<vmem>>, %arg1: memref<32x96xf32, #tpu.memory_space<vmem>>, %arg2: memref<1x96xf32, #tpu.memory_space<vmem>>, %arg3: memref<32x32xf32, #tpu.memory_space<vmem>>, %arg4: memref<1x32xf32, #tpu.memory_space<vmem>>, %arg5: memref<1x32xf32, #tpu.memory_space<vmem>>, %arg6: memref<1x32xf32, #tpu.memory_space<vmem>>, %arg7: memref<16x32xf32, #tpu.memory_space<vmem>>) attributes {dimension_semantics = [], scalar_prefetch = 0 : i64, scratch_operands = 0 : i64, tpu.core_type = #tpu.core_type<tc>} {
    %c0 = arith.constant 0 : index
    %c0_0 = arith.constant 0 : index
    %0 = vector.load %arg0[%c0, %c0_0] : memref<16x32xf32, #tpu.memory_space<vmem>>, vector<16x32xf32>
    %c0_1 = arith.constant 0 : index
    %c0_2 = arith.constant 0 : index
    %1 = vector.load %arg1[%c0_1, %c0_2] : memref<32x96xf32, #tpu.memory_space<vmem>>, vector<32x96xf32>
    %cst = arith.constant dense<0.000000e+00> : vector<16x96xf32>
    %2 = tpu.matmul %0, %1, %cst {dimension_numbers = #tpu.dot_dimension_numbers<[1], [0], [0], [1], [0, 0, 1, 1], [], []>} : vector<16x32xf32>, vector<32x96xf32>, vector<16x96xf32> -> vector<16x96xf32>
    %c0_3 = arith.constant 0 : index
    %c0_4 = arith.constant 0 : index
    %3 = vector.load %arg2[%c0_3, %c0_4] : memref<1x96xf32, #tpu.memory_space<vmem>>, vector<1x96xf32>
    %4 = vector.broadcast %3 : vector<1x96xf32> to vector<16x96xf32>
    %5 = arith.addf %2, %4 : vector<16x96xf32>
    %6 = vector.shape_cast %5 : vector<16x96xf32> to vector<2x8x96xf32>
    %c0_5 = arith.constant 0 : index
    %c0_6 = arith.constant 0 : index
    %7 = vector.load %arg3[%c0_5, %c0_6] : memref<32x32xf32, #tpu.memory_space<vmem>>, vector<32x32xf32>
    %cst_7 = arith.constant 0.000000e+00 : f32
    %8 = vector.broadcast %cst_7 : f32 to vector<16x32xf32>
    %9 = vector.extract_strided_slice %6 {offsets = [0, 0, 0], sizes = [2, 8, 8], strides = [1, 1, 1]} : vector<2x8x96xf32> to vector<2x8x8xf32>
    %10 = vector.extract_strided_slice %6 {offsets = [0, 0, 32], sizes = [2, 8, 8], strides = [1, 1, 1]} : vector<2x8x96xf32> to vector<2x8x8xf32>
    %11 = vector.extract_strided_slice %6 {offsets = [0, 0, 64], sizes = [2, 8, 8], strides = [1, 1, 1]} : vector<2x8x96xf32> to vector<2x8x8xf32>
    "tpu.trace_start"() <{level = 10 : i32, message = "bqd,bkd->bqk"}> : () -> ()
    %cst_8 = arith.constant dense<0.000000e+00> : vector<2x8x8xf32>
    %12 = tpu.matmul %9, %10, %cst_8 {dimension_numbers = #tpu.dot_dimension_numbers<[2], [2], [1], [1], [0, 0, 0, 1, 1, 1], [0], [0]>} : vector<2x8x8xf32>, vector<2x8x8xf32>, vector<2x8x8xf32> -> vector<2x8x8xf32>
    "tpu.trace_stop"() : () -> ()
    %cst_9 = arith.constant dense<0xFF800000> : vector<2x8xf32>
    %13 = vector.multi_reduction <maximumf>, %12, %cst_9 [2] : vector<2x8x8xf32> to vector<2x8xf32>
    %14 = vector.shape_cast %13 : vector<2x8xf32> to vector<2x8x1xf32>
    %15 = vector.broadcast %14 : vector<2x8x1xf32> to vector<2x8x8xf32>
    %16 = arith.subf %12, %15 : vector<2x8x8xf32>
    %17 = math.exp %16 : vector<2x8x8xf32>
    %cst_10 = arith.constant dense<0.000000e+00> : vector<2x8xf32>
    %18 = vector.multi_reduction <add>, %17, %cst_10 [2] : vector<2x8x8xf32> to vector<2x8xf32>
    %19 = vector.shape_cast %18 : vector<2x8xf32> to vector<2x8x1xf32>
    %20 = tpu.reciprocal %19 {approx = true} : vector<2x8x1xf32> -> vector<2x8x1xf32>
    %21 = vector.broadcast %20 : vector<2x8x1xf32> to vector<2x8x8xf32>
    %22 = arith.mulf %17, %21 : vector<2x8x8xf32>
    "tpu.trace_start"() <{level = 10 : i32, message = "bqk,bkd->bqd"}> : () -> ()
    %cst_11 = arith.constant dense<0.000000e+00> : vector<2x8x8xf32>
    %23 = tpu.matmul %22, %11, %cst_11 {dimension_numbers = #tpu.dot_dimension_numbers<[2], [1], [1], [2], [0, 0, 0, 1, 1, 2], [0], [0]>} : vector<2x8x8xf32>, vector<2x8x8xf32>, vector<2x8x8xf32> -> vector<2x8x8xf32>
    "tpu.trace_stop"() : () -> ()
    %24 = vector.shape_cast %23 : vector<2x8x8xf32> to vector<16x8xf32>
    %25 = vector.extract_strided_slice %7 {offsets = [0, 0], sizes = [8, 32], strides = [1, 1]} : vector<32x32xf32> to vector<8x32xf32>
    %cst_12 = arith.constant dense<0.000000e+00> : vector<16x32xf32>
    %26 = tpu.matmul %24, %25, %cst_12 {dimension_numbers = #tpu.dot_dimension_numbers<[1], [0], [0], [1], [0, 0, 1, 1], [], []>} : vector<16x8xf32>, vector<8x32xf32>, vector<16x32xf32> -> vector<16x32xf32>
    %27 = arith.addf %8, %26 : vector<16x32xf32>
    %28 = vector.extract_strided_slice %6 {offsets = [0, 0, 8], sizes = [2, 8, 8], strides = [1, 1, 1]} : vector<2x8x96xf32> to vector<2x8x8xf32>
    %29 = vector.extract_strided_slice %6 {offsets = [0, 0, 40], sizes = [2, 8, 8], strides = [1, 1, 1]} : vector<2x8x96xf32> to vector<2x8x8xf32>
    %30 = vector.extract_strided_slice %6 {offsets = [0, 0, 72], sizes = [2, 8, 8], strides = [1, 1, 1]} : vector<2x8x96xf32> to vector<2x8x8xf32>
    "tpu.trace_start"() <{level = 10 : i32, message = "bqd,bkd->bqk"}> : () -> ()
    %cst_13 = arith.constant dense<0.000000e+00> : vector<2x8x8xf32>
    %31 = tpu.matmul %28, %29, %cst_13 {dimension_numbers = #tpu.dot_dimension_numbers<[2], [2], [1], [1], [0, 0, 0, 1, 1, 1], [0], [0]>} : vector<2x8x8xf32>, vector<2x8x8xf32>, vector<2x8x8xf32> -> vector<2x8x8xf32>
    "tpu.trace_stop"() : () -> ()
    %cst_14 = arith.constant dense<0xFF800000> : vector<2x8xf32>
    %32 = vector.multi_reduction <maximumf>, %31, %cst_14 [2] : vector<2x8x8xf32> to vector<2x8xf32>
    %33 = vector.shape_cast %32 : vector<2x8xf32> to vector<2x8x1xf32>
    %34 = vector.broadcast %33 : vector<2x8x1xf32> to vector<2x8x8xf32>
    %35 = arith.subf %31, %34 : vector<2x8x8xf32>
    %36 = math.exp %35 : vector<2x8x8xf32>
    %cst_15 = arith.constant dense<0.000000e+00> : vector<2x8xf32>
    %37 = vector.multi_reduction <add>, %36, %cst_15 [2] : vector<2x8x8xf32> to vector<2x8xf32>
    %38 = vector.shape_cast %37 : vector<2x8xf32> to vector<2x8x1xf32>
    %39 = tpu.reciprocal %38 {approx = true} : vector<2x8x1xf32> -> vector<2x8x1xf32>
    %40 = vector.broadcast %39 : vector<2x8x1xf32> to vector<2x8x8xf32>
    %41 = arith.mulf %36, %40 : vector<2x8x8xf32>
    "tpu.trace_start"() <{level = 10 : i32, message = "bqk,bkd->bqd"}> : () -> ()
    %cst_16 = arith.constant dense<0.000000e+00> : vector<2x8x8xf32>
    %42 = tpu.matmul %41, %30, %cst_16 {dimension_numbers = #tpu.dot_dimension_numbers<[2], [1], [1], [2], [0, 0, 0, 1, 1, 2], [0], [0]>} : vector<2x8x8xf32>, vector<2x8x8xf32>, vector<2x8x8xf32> -> vector<2x8x8xf32>
    "tpu.trace_stop"() : () -> ()
    %43 = vector.shape_cast %42 : vector<2x8x8xf32> to vector<16x8xf32>
    %44 = vector.extract_strided_slice %7 {offsets = [8, 0], sizes = [8, 32], strides = [1, 1]} : vector<32x32xf32> to vector<8x32xf32>
    %cst_17 = arith.constant dense<0.000000e+00> : vector<16x32xf32>
    %45 = tpu.matmul %43, %44, %cst_17 {dimension_numbers = #tpu.dot_dimension_numbers<[1], [0], [0], [1], [0, 0, 1, 1], [], []>} : vector<16x8xf32>, vector<8x32xf32>, vector<16x32xf32> -> vector<16x32xf32>
    %46 = arith.addf %27, %45 : vector<16x32xf32>
    %47 = vector.extract_strided_slice %6 {offsets = [0, 0, 16], sizes = [2, 8, 8], strides = [1, 1, 1]} : vector<2x8x96xf32> to vector<2x8x8xf32>
    %48 = vector.extract_strided_slice %6 {offsets = [0, 0, 48], sizes = [2, 8, 8], strides = [1, 1, 1]} : vector<2x8x96xf32> to vector<2x8x8xf32>
    %49 = vector.extract_strided_slice %6 {offsets = [0, 0, 80], sizes = [2, 8, 8], strides = [1, 1, 1]} : vector<2x8x96xf32> to vector<2x8x8xf32>
    "tpu.trace_start"() <{level = 10 : i32, message = "bqd,bkd->bqk"}> : () -> ()
    %cst_18 = arith.constant dense<0.000000e+00> : vector<2x8x8xf32>
    %50 = tpu.matmul %47, %48, %cst_18 {dimension_numbers = #tpu.dot_dimension_numbers<[2], [2], [1], [1], [0, 0, 0, 1, 1, 1], [0], [0]>} : vector<2x8x8xf32>, vector<2x8x8xf32>, vector<2x8x8xf32> -> vector<2x8x8xf32>
    "tpu.trace_stop"() : () -> ()
    %cst_19 = arith.constant dense<0xFF800000> : vector<2x8xf32>
    %51 = vector.multi_reduction <maximumf>, %50, %cst_19 [2] : vector<2x8x8xf32> to vector<2x8xf32>
    %52 = vector.shape_cast %51 : vector<2x8xf32> to vector<2x8x1xf32>
    %53 = vector.broadcast %52 : vector<2x8x1xf32> to vector<2x8x8xf32>
    %54 = arith.subf %50, %53 : vector<2x8x8xf32>
    %55 = math.exp %54 : vector<2x8x8xf32>
    %cst_20 = arith.constant dense<0.000000e+00> : vector<2x8xf32>
    %56 = vector.multi_reduction <add>, %55, %cst_20 [2] : vector<2x8x8xf32> to vector<2x8xf32>
    %57 = vector.shape_cast %56 : vector<2x8xf32> to vector<2x8x1xf32>
    %58 = tpu.reciprocal %57 {approx = true} : vector<2x8x1xf32> -> vector<2x8x1xf32>
    %59 = vector.broadcast %58 : vector<2x8x1xf32> to vector<2x8x8xf32>
    %60 = arith.mulf %55, %59 : vector<2x8x8xf32>
    "tpu.trace_start"() <{level = 10 : i32, message = "bqk,bkd->bqd"}> : () -> ()
    %cst_21 = arith.constant dense<0.000000e+00> : vector<2x8x8xf32>
    %61 = tpu.matmul %60, %49, %cst_21 {dimension_numbers = #tpu.dot_dimension_numbers<[2], [1], [1], [2], [0, 0, 0, 1, 1, 2], [0], [0]>} : vector<2x8x8xf32>, vector<2x8x8xf32>, vector<2x8x8xf32> -> vector<2x8x8xf32>
    "tpu.trace_stop"() : () -> ()
    %62 = vector.shape_cast %61 : vector<2x8x8xf32> to vector<16x8xf32>
    %63 = vector.extract_strided_slice %7 {offsets = [16, 0], sizes = [8, 32], strides = [1, 1]} : vector<32x32xf32> to vector<8x32xf32>
    %cst_22 = arith.constant dense<0.000000e+00> : vector<16x32xf32>
    %64 = tpu.matmul %62, %63, %cst_22 {dimension_numbers = #tpu.dot_dimension_numbers<[1], [0], [0], [1], [0, 0, 1, 1], [], []>} : vector<16x8xf32>, vector<8x32xf32>, vector<16x32xf32> -> vector<16x32xf32>
    %65 = arith.addf %46, %64 : vector<16x32xf32>
    %66 = vector.extract_strided_slice %6 {offsets = [0, 0, 24], sizes = [2, 8, 8], strides = [1, 1, 1]} : vector<2x8x96xf32> to vector<2x8x8xf32>
    %67 = vector.extract_strided_slice %6 {offsets = [0, 0, 56], sizes = [2, 8, 8], strides = [1, 1, 1]} : vector<2x8x96xf32> to vector<2x8x8xf32>
    %68 = vector.extract_strided_slice %6 {offsets = [0, 0, 88], sizes = [2, 8, 8], strides = [1, 1, 1]} : vector<2x8x96xf32> to vector<2x8x8xf32>
    "tpu.trace_start"() <{level = 10 : i32, message = "bqd,bkd->bqk"}> : () -> ()
    %cst_23 = arith.constant dense<0.000000e+00> : vector<2x8x8xf32>
    %69 = tpu.matmul %66, %67, %cst_23 {dimension_numbers = #tpu.dot_dimension_numbers<[2], [2], [1], [1], [0, 0, 0, 1, 1, 1], [0], [0]>} : vector<2x8x8xf32>, vector<2x8x8xf32>, vector<2x8x8xf32> -> vector<2x8x8xf32>
    "tpu.trace_stop"() : () -> ()
    %cst_24 = arith.constant dense<0xFF800000> : vector<2x8xf32>
    %70 = vector.multi_reduction <maximumf>, %69, %cst_24 [2] : vector<2x8x8xf32> to vector<2x8xf32>
    %71 = vector.shape_cast %70 : vector<2x8xf32> to vector<2x8x1xf32>
    %72 = vector.broadcast %71 : vector<2x8x1xf32> to vector<2x8x8xf32>
    %73 = arith.subf %69, %72 : vector<2x8x8xf32>
    %74 = math.exp %73 : vector<2x8x8xf32>
    %cst_25 = arith.constant dense<0.000000e+00> : vector<2x8xf32>
    %75 = vector.multi_reduction <add>, %74, %cst_25 [2] : vector<2x8x8xf32> to vector<2x8xf32>
    %76 = vector.shape_cast %75 : vector<2x8xf32> to vector<2x8x1xf32>
    %77 = tpu.reciprocal %76 {approx = true} : vector<2x8x1xf32> -> vector<2x8x1xf32>
    %78 = vector.broadcast %77 : vector<2x8x1xf32> to vector<2x8x8xf32>
    %79 = arith.mulf %74, %78 : vector<2x8x8xf32>
    "tpu.trace_start"() <{level = 10 : i32, message = "bqk,bkd->bqd"}> : () -> ()
    %cst_26 = arith.constant dense<0.000000e+00> : vector<2x8x8xf32>
    %80 = tpu.matmul %79, %68, %cst_26 {dimension_numbers = #tpu.dot_dimension_numbers<[2], [1], [1], [2], [0, 0, 0, 1, 1, 2], [0], [0]>} : vector<2x8x8xf32>, vector<2x8x8xf32>, vector<2x8x8xf32> -> vector<2x8x8xf32>
    "tpu.trace_stop"() : () -> ()
    %81 = vector.shape_cast %80 : vector<2x8x8xf32> to vector<16x8xf32>
    %82 = vector.extract_strided_slice %7 {offsets = [24, 0], sizes = [8, 32], strides = [1, 1]} : vector<32x32xf32> to vector<8x32xf32>
    %cst_27 = arith.constant dense<0.000000e+00> : vector<16x32xf32>
    %83 = tpu.matmul %81, %82, %cst_27 {dimension_numbers = #tpu.dot_dimension_numbers<[1], [0], [0], [1], [0, 0, 1, 1], [], []>} : vector<16x8xf32>, vector<8x32xf32>, vector<16x32xf32> -> vector<16x32xf32>
    %84 = arith.addf %65, %83 : vector<16x32xf32>
    %c0_28 = arith.constant 0 : index
    %c0_29 = arith.constant 0 : index
    %85 = vector.load %arg4[%c0_28, %c0_29] : memref<1x32xf32, #tpu.memory_space<vmem>>, vector<1x32xf32>
    %86 = vector.broadcast %85 : vector<1x32xf32> to vector<16x32xf32>
    %87 = arith.addf %84, %86 : vector<16x32xf32>
    %88 = arith.addf %0, %87 : vector<16x32xf32>
    %cst_30 = arith.constant dense<0.000000e+00> : vector<16xf32>
    %89 = vector.multi_reduction <add>, %88, %cst_30 [1] : vector<16x32xf32> to vector<16xf32>
    %90 = vector.shape_cast %89 : vector<16xf32> to vector<16x1xf32>
    %cst_31 = arith.constant 3.200000e+01 : f32
    %91 = vector.broadcast %cst_31 : f32 to vector<16x1xf32>
    %92 = arith.divf %90, %91 : vector<16x1xf32>
    %93 = vector.broadcast %92 : vector<16x1xf32> to vector<16x32xf32>
    %94 = arith.subf %88, %93 : vector<16x32xf32>
    %95 = arith.mulf %94, %94 : vector<16x32xf32>
    %cst_32 = arith.constant dense<0.000000e+00> : vector<16xf32>
    %96 = vector.multi_reduction <add>, %95, %cst_32 [1] : vector<16x32xf32> to vector<16xf32>
    %97 = vector.shape_cast %96 : vector<16xf32> to vector<16x1xf32>
    %cst_33 = arith.constant 3.200000e+01 : f32
    %98 = vector.broadcast %cst_33 : f32 to vector<16x1xf32>
    %99 = arith.divf %97, %98 : vector<16x1xf32>
    %cst_34 = arith.constant 9.99999974E-6 : f32
    %100 = vector.broadcast %cst_34 : f32 to vector<16x1xf32>
    %101 = arith.addf %99, %100 : vector<16x1xf32>
    %102 = math.rsqrt %101 : vector<16x1xf32>
    %103 = vector.broadcast %102 : vector<16x1xf32> to vector<16x32xf32>
    %104 = arith.mulf %94, %103 : vector<16x32xf32>
    %c0_35 = arith.constant 0 : index
    %c0_36 = arith.constant 0 : index
    %105 = vector.load %arg5[%c0_35, %c0_36] : memref<1x32xf32, #tpu.memory_space<vmem>>, vector<1x32xf32>
    %106 = vector.broadcast %105 : vector<1x32xf32> to vector<16x32xf32>
    %107 = arith.mulf %104, %106 : vector<16x32xf32>
    %c0_37 = arith.constant 0 : index
    %c0_38 = arith.constant 0 : index
    %108 = vector.load %arg6[%c0_37, %c0_38] : memref<1x32xf32, #tpu.memory_space<vmem>>, vector<1x32xf32>
    %109 = vector.broadcast %108 : vector<1x32xf32> to vector<16x32xf32>
    %110 = arith.addf %107, %109 : vector<16x32xf32>
    %c0_39 = arith.constant 0 : index
    %c0_40 = arith.constant 0 : index
    %111 = vector.load %arg7[%c0_39, %c0_40] : memref<16x32xf32, #tpu.memory_space<vmem>>, vector<16x32xf32>
    tpu.vector_store %arg7[%c0_39, %c0_40], %110 {strides = array<i32>} : memref<16x32xf32, #tpu.memory_space<vmem>>, vector<16x32xf32>,
    return
  }
}

</mosaic_0001>

<bundles_post_ra>
// kernel: tpu_custom_call.1
= control target key start
LH: loop header
LB: loop body
LE: loop exit
PB: predicated region body
PF: predicated region fallthrough
CT: control target
= control target key end

     0   :  { %12 = vsyncpa [#allocation3], 0  ;;  %s2477_s0 = inlined_call_operand.hbm [shape: f32[16,32], index: 0, kind: input, shape index: {}]   ;;  %s2478_s1 = inlined_call_operand.hbm [shape: f32[32,96], index: 1, kind: input, shape index: {}]   ;;  %s2479_s2 = inlined_call_operand.vmem [shape: f32[1,96], index: 2, kind: input, shape index: {}]   ;;  %s2480_s3 = inlined_call_operand.hbm [shape: f32[32,32], index: 3, kind: input, shape index: {}]   ;;  %s2481_s4 = inlined_call_operand.vmem [shape: f32[1,32], index: 4, kind: input, shape index: {}]   ;;  %s2482_s5 = inlined_call_operand.vmem [shape: f32[1,32], index: 5, kind: input, shape index: {}]   ;;  %s2483_s6 = inlined_call_operand.vmem [shape: f32[1,32], index: 6, kind: input, shape index: {}]   ;;  %s2484_s7 = inlined_call_operand.hbm [shape: f32[16,32], index: 7, kind: output, shape index: {}]  }
   0x1   :  { %13 = vsyncpa [#allocation6], 0 }
   0x2   :  { %14 = vsyncpa [#allocation4], 0  ;;  %s2230_s24 = smov [#allocation5]   ;;  %s2231_s26 = smov [#allocation2]  }
   0x3   :  { %s32_s25 = sshll.u32 %s2230_s24, 4  ;;  %s20_s27 = sshll.u32 %s2231_s26, 4  ;;  %s33_s25 = int_to_ptr.vmem [resolvable:$true] %s32_s25  ;;  %s21_s27 = int_to_ptr.vmem [resolvable:$true] %s20_s27 }
   0x4   :  { %s2152_s28 = scalar_lea.vmem %s33_s25, 512  ;;  %p2157_p1 = scmp.lt.s32.totalorder %s33_s25, %s33_s25 }
   0x5   :  { %p2153_p0 = scmp.ne.s32.totalorder %s33_s25, %s2152_s28  ;;  %p2158_p2 = scmp.lt.s32.totalorder %s2152_s28, %s2152_s28 }
   0x7   :  { %p2159_p3 = por %p2158_p2, %p2157_p1 }
   0x9   :  { %p2160_p4 = pnand %p2159_p3, %p2153_p0 }
   0xb   :  { %2163 = shalt.err (!%p2160_p4)
}
   0xc   :  { %s2232_s29 = smov 128   ;;  %s2233_s30 = smov 8  }
   0xd   :  { %38 = dma.hbm_to_vmem [thread:$0]  %s2478_s1, 512, %s33_s25, [#allocation6], %s2232_s29, %s2232_s29, %s2233_s30  }
   0xe   :  { %s2172_s10 = scalar_lea.vmem %s21_s27, 256  ;;  %p2177_p6 = scmp.lt.s32.totalorder %s21_s27, %s21_s27 }
   0xf   :  { %p2173_p5 = scmp.ne.s32.totalorder %s21_s27, %s2172_s10  ;;  %p2178_p7 = scmp.lt.s32.totalorder %s2172_s10, %s2172_s10 }
  0x11   :  { %p2179_p8 = por %p2178_p7, %p2177_p6 }
  0x13   :  { %p2180_p9 = pnand %p2179_p8, %p2173_p5 }
  0x15   :  { %2183 = shalt.err (!%p2180_p9)
}
  0x16   :  { %26 = dma.hbm_to_vmem [thread:$0]  %s2477_s0, 256, %s21_s27, [#allocation3], %s2232_s29, %s2232_s29, %s2233_s30  }
  0x17   :  { %s2234_s13 = smov [#allocation7]  }
  0x18   :  { %s46_s14 = sshll.u32 %s2234_s13, 4  ;;  %s47_s14 = int_to_ptr.vmem [resolvable:$true] %s46_s14 }
  0x19   :  { %s2192_s15 = scalar_lea.vmem %s47_s14, 512  ;;  %p2197_p11 = scmp.lt.s32.totalorder %s47_s14, %s47_s14 }
  0x1a   :  { %p2193_p10 = scmp.ne.s32.totalorder %s47_s14, %s2192_s15  ;;  %p2198_p12 = scmp.lt.s32.totalorder %s2192_s15, %s2192_s15 }
  0x1c   :  { %p2199_p13 = por %p2198_p12, %p2197_p11 }
  0x1e   :  { %p2200_p0 = pnand %p2199_p13, %p2193_p10 }
  0x20   :  { %2203 = shalt.err (!%p2200_p0)
}
  0x21   :  { %52 = dma.hbm_to_vmem [thread:$0]  %s2480_s3, 512, %s47_s14, [#allocation6], %s2232_s29, %s2232_s29, %s2233_s30  }
  0x22   :  { %2224 = dma.done.wait [#allocation3], 256  }
  0x23   :  { %2225 = vsyncadd [#allocation3], 4294967040 }
  0x24   :  { %2226 = dma.done.wait [#allocation6], 1024  }
  0x25   :  { %2227 = vsyncadd [#allocation6], 4294966272  ;;  %vm81_vm0 = vcmask 261120   ;;  %v73_v0 = vld [vmem:[#allocation5 + $0x18] sm:$0xff]  ;;  %v72_v1 = vld [vmem:[#allocation5 + $0x10] sm:$0xff]  ;;  %v2235_v6 = vmov 0.0  }
  0x26   :  { %1978 = vmatprep.subr.mxu0 %v73_v0  ;;  %v2307_v2 = vld [vmem:[#allocation2] sm:$0xff]  ;;  %v71_v3 = vld [vmem:[#allocation5 + $0x8] sm:$0xff]  ;;  %v70_v4 = vld [vmem:[#allocation5] sm:$0xff]  ;;  %1989 = vmatprep.subr.mxu1 %v2235_v6  ;;  %vm2236_vm1 = vmmov 0   ;;  %s2237_s17 = smov 96   ;;  %vm170_vm2 = vcmask 64512  }
  0x27   :  { %1979 = vmatpush3.msra.mxu0 %v73_v0  ;;  %1986 = vmatprep.mubr.msk.f32.mxu0 %vm81_vm0, %v2307_v2  ;;  %v2311_v5 = vld [vmem:[#allocation2 + $0x8] sm:$0xff]  ;;  %v1890_v8 = vld [vmem:[%s2479_s2] ss:$0 sm:$0xff]  ;;  %s2238_s2 = smov 64   ;;  %s2239_s18 = smov 88   ;;  %v163_v63 = vld [vmem:[#allocation7] sm:$0xff] }
  0x28   :  { %1980 = vmatprep.subr.mxu0 %v72_v1  ;;  %1991 = vmatprep.mubr.msk.f32.mxu1 %vm2236_vm1, %v2235_v6  ;;  %s2240_s19 = smov 120   ;;  %s2241_s20 = smov 56  }
  0x29   :  { %1981 = vmatpush3.msra.mxu0 %v72_v1  ;;  %s2242_s21 = smov 112   ;;  %s2243_s22 = smov 80  }
  0x2a   :  { %1982 = vmatprep.subr.mxu0 %v71_v3  ;;  %s2244_s23 = smov 48   ;;  %s2245_s24 = smov 72  }
  0x2b   :  { %1983 = vmatpush3.msra.mxu0 %v71_v3  ;;  %s2246_s25 = smov 104   ;;  %s2247_s26 = smov 40  }
  0x2c   :  { %1984 = vmatprep.subr.mxu0 %v70_v4  ;;  %s2248_s11 = smov [#allocation8]  }
  0x2d   :  { %1985 = vmatpush3.msra.mxu0 %v70_v4  ;;  %s1877_s12 = sshll.u32 %s2248_s11, 4  ;;  %s1878_s12 = int_to_ptr.vmem [resolvable:$true] %s1877_s12 }
  0x2e   :  { %1987 = vmatmul.mubr.msk.f32.vlgmr.msra.gmra.mxu0 %vm81_vm0, %v2311_v5  ;;  %1999 = vmatprep.subr.mxu0 %v2235_v6  ;;  %s2204_s13 = scalar_lea.vmem %s1878_s12, 256  ;;  %p2209_p2 = scmp.lt.s32.totalorder %s1878_s12, %s1878_s12 }
  0x2f   :  { %2001 = vmatprep.mubr.msk.f32.mxu0 %vm2236_vm1, %v2235_v6  ;;  %p2205_p1 = scmp.ne.s32.totalorder %s1878_s12, %s2204_s13  ;;  %p2210_p3 = scmp.lt.s32.totalorder %s2204_s13, %s2204_s13 }
  0x31   :  { %p2211_p4 = por %p2210_p3, %p2209_p2 }
  0x33   :  { %p2212_p5 = pnand %p2211_p4, %p2205_p1 }
  0xee   :  { %v1988_v7 = vpop.f32.mrf.mxu0 }
  0xef   :  { %v2327_v11 = vadd.f32 %v1988_v7, %v1890_v8 }
  0xf0   :  { %v154_v9 = vpop.f32.mrf.mxu0 }
  0xf1   :  { %v2324_v10 = vadd.f32 %v1890_v8, %v154_v9 }
  0xf3   :  { %168 = vrot.lane.b32.xlu0 %v2324_v10, %s2237_s17 }
  0xf7   :  { %246 = vrot.lane.b32.xlu0 %v2327_v11, %s2237_s17 }
 0x165   :  { %v169_v12 = vpop.permute.xlu0 %168 }
 0x166   :  { %1990 = vmatpush3.xpose.msk.msra.mxu1 %vm170_vm2, %v169_v12 }
 0x167   :  { %1994 = vmatprep.subr.mxu1 %v2235_v6 }
 0x169   :  { %1992 = vmatmul.mubr.msk.f32.vlgmr.msra.gmra.mxu1 %vm170_vm2, %v2324_v10  ;;  %v247_v13 = vpop.permute.xlu0 %246 }
 0x16a   :  { %1995 = vmatpush3.xpose.msk.msra.mxu1 %vm170_vm2, %v247_v13  ;;  %1996 = vmatprep.mubr.msk.f32.mxu1 %vm2236_vm1, %v2235_v6 }
 0x16b   :  { %2004 = vmatprep.subr.mxu1 %v2235_v6 }
 0x16d   :  { %1997 = vmatmul.mubr.msk.f32.vlgmr.msra.gmra.mxu1 %vm170_vm2, %v2327_v11 }
 0x16e   :  { %2006 = vmatprep.mubr.msk.f32.mxu1 %vm2236_vm1, %v2235_v6 }
 0x229   :  { %v241_v14 = vpop.f32.mrf.mxu1 }
 0x22a   :  { %v322_v15 = vsel %vm170_vm2, %v241_v14, -inf }
 0x22b   :  { %323 = vmax.xlane.f32.xlu1 %v322_v15  ;;  %v1993_v16 = vpop.f32.mrf.mxu1  ;;  %v164_v15 = vld [vmem:[#allocation7 + $0x8] sm:$0xff] }
 0x22d   :  { %v318_v17 = vpop.f32.mrf.mxu1 }
 0x22e   :  { %v325_v18 = vsel %vm170_vm2, %v318_v17, -inf }
 0x22f   :  { %326 = vmax.xlane.f32.xlu1 %v325_v18  ;;  %v1998_v19 = vpop.f32.mrf.mxu1 }
 0x240   :  { %344 = vrot.lane.b32.xlu1 %v2324_v10, %s2238_s2 }
 0x244   :  { %420 = vrot.lane.b32.xlu1 %v2327_v11, %s2238_s2 }
 0x248   :  { %498 = vrot.lane.b32.xlu1 %v2324_v10, %s2239_s18 }
 0x24c   :  { %576 = vrot.lane.b32.xlu1 %v2327_v11, %s2239_s18 }
 0x2b4   :  { %v324_v20 = vpop.xlane.xlu1 %323 }
 0x2b5   :  { %v328_v21 = vsub.f32 %v241_v14, %v324_v20 }
 0x2b7   :  { %v330_v22 = vmul.f32 1.442695, %v328_v21 }
 0x2b8   :  { %v327_v23 = vpop.xlane.xlu1 %326 }
 0x2b9   :  { %2108 = vpow2.f32 %v330_v22  ;;  %v329_v24 = vsub.f32 %v318_v17, %v327_v23 }
 0x2bb   :  { %v332_v25 = vmul.f32 1.442695, %v329_v24 }
 0x2bc   :  { %v345_v26 = vpop.permute.xlu1 %344 }
 0x2bd   :  { %2110 = vpow2.f32 %v332_v25  ;;  %2000 = vmatpush3.msra.mxu0 %v345_v26 }
 0x2be   :  { %2009 = vmatprep.subr.mxu0 %v2235_v6 }
 0x2c0   :  { %v421_v27 = vpop.permute.xlu1 %420 }
 0x2c1   :  { %2005 = vmatpush3.msra.mxu1 %v421_v27 }
 0x2c2   :  { %2014 = vmatprep.subr.mxu1 %v2235_v6 }
 0x2c4   :  { %v499_v32 = vpop.permute.xlu1 %498 }
 0x2c6   :  { %v2109_v28 = vpop.eup %2108 }
 0x2c7   :  { %v334_v29 = vsel %vm170_vm2, %v2109_v28, 0.0 }
 0x2c8   :  { %335 = vadd.xlane.f32.xlu0 %v334_v29  ;;  %v577_v33 = vpop.permute.xlu1 %576 }
 0x2ca   :  { %v2111_v30 = vpop.eup %2110 }
 0x2cb   :  { %v337_v31 = vsel %vm170_vm2, %v2111_v30, 0.0 }
 0x2cc   :  { %338 = vadd.xlane.f32.xlu1 %v337_v31 }
 0x2dd   :  { %574 = vrot.lane.b32.xlu1 %v2327_v11, %s2240_s19 }
 0x2de   :  { %496 = vrot.lane.b32.xlu0 %v2324_v10, %s2240_s19 }
 0x351   :  { %v336_v34 = vpop.xlane.xlu0 %335 }
 0x352   :  { %2112 = vrcp.f32 %v336_v34 }
 0x355   :  { %v339_v35 = vpop.xlane.xlu1 %338  ;;  %v497_v40 = vpop.permute.xlu0 %496 }
 0x356   :  { %2114 = vrcp.f32 %v339_v35 }
 0x359   :  { %v575_v41 = vpop.permute.xlu1 %574 }
 0x35f   :  { %v2113_v36 = vpop.eup %2112 }
 0x360   :  { %v342_v37 = vmul.f32 %v2113_v36, %v2109_v28 }
 0x362   :  { %2002 = vmatmul.mubr.msk.f32.vlgmr.msra.gmra.mxu0 %vm170_vm2, %v342_v37 }
 0x363   :  { %v2115_v38 = vpop.eup %2114  ;;  %2010 = vmatpush3.xpose.msk.msra.mxu0 %vm170_vm2, %v499_v32  ;;  %2011 = vmatprep.mubr.msk.f32.mxu0 %vm2236_vm1, %v2235_v6 }
 0x364   :  { %v343_v39 = vmul.f32 %v2115_v38, %v2111_v30  ;;  %2019 = vmatprep.subr.mxu0 %v2235_v6 }
 0x366   :  { %2007 = vmatmul.mubr.msk.f32.vlgmr.msra.gmra.mxu1 %vm170_vm2, %v343_v39  ;;  %2012 = vmatmul.mubr.msk.f32.vlgmr.msra.gmra.mxu0 %vm170_vm2, %v497_v40 }
 0x367   :  { %2015 = vmatpush3.xpose.msk.msra.mxu1 %vm170_vm2, %v577_v33  ;;  %2016 = vmatprep.mubr.msk.f32.mxu1 %vm2236_vm1, %v2235_v6 }
 0x368   :  { %2024 = vmatprep.subr.mxu1 %v2235_v6  ;;  %2021 = vmatprep.mubr.msk.f32.mxu0 %vm2236_vm1, %v2235_v6 }
 0x36a   :  { %2017 = vmatmul.mubr.msk.f32.vlgmr.msra.gmra.mxu1 %vm170_vm2, %v575_v41 }
 0x36b   :  { %2026 = vmatprep.mubr.msk.f32.mxu1 %vm2236_vm1, %v2235_v6 }
 0x422   :  { %v416_v42 = vpop.f32.mrf.mxu0 }
 0x424   :  { %v2003_v43 = vpop.f32.mrf.mxu0 }
 0x426   :  { %v492_v44 = vpop.f32.mrf.mxu1  ;;  %v570_v45 = vpop.f32.mrf.mxu0 }
 0x427   :  { %v652_v46 = vsel %vm170_vm2, %v570_v45, -inf }
 0x428   :  { %v2008_v47 = vpop.f32.mrf.mxu1  ;;  %653 = vmax.xlane.f32.xlu1 %v652_v46  ;;  %v2013_v48 = vpop.f32.mrf.mxu0 }
 0x42a   :  { %v648_v49 = vpop.f32.mrf.mxu1 }
 0x42b   :  { %v655_v50 = vsel %vm170_vm2, %v648_v49, -inf }
 0x42c   :  { %656 = vmax.xlane.f32.xlu0 %v655_v50  ;;  %v2018_v51 = vpop.f32.mrf.mxu1 }
 0x42d   :  { %v165_v51 = vld [vmem:[#allocation7 + $0x10] sm:$0xff] }
 0x442   :  { %750 = vrot.lane.b32.xlu0 %v2327_v11, %s2241_s20 }
 0x446   :  { %988 = vrot.lane.b32.xlu0 %v2324_v10, %s2242_s21 }
 0x4b1   :  { %v654_v52 = vpop.xlane.xlu1 %653 }
 0x4b2   :  { %v658_v53 = vsub.f32 %v570_v45, %v654_v52 }
 0x4b4   :  { %v660_v54 = vmul.f32 1.442695, %v658_v53 }
 0x4b5   :  { %v657_v55 = vpop.xlane.xlu0 %656 }
 0x4b6   :  { %2116 = vpow2.f32 %v660_v54  ;;  %v659_v56 = vsub.f32 %v648_v49, %v657_v55 }
 0x4b8   :  { %v662_v57 = vmul.f32 1.442695, %v659_v56 }
 0x4b9   :  { %v751_v58 = vpop.permute.xlu0 %750 }
 0x4ba   :  { %2118 = vpow2.f32 %v662_v57  ;;  %2025 = vmatpush3.msra.mxu1 %v751_v58 }
 0x4bb   :  { %2034 = vmatprep.subr.mxu1 %v163_v63 }
 0x4bd   :  { %v989_v20 = vpop.permute.xlu0 %988 }
 0x4c3   :  { %v2117_v59 = vpop.eup %2116 }
 0x4c4   :  { %v664_v60 = vsel %vm170_vm2, %v2117_v59, 0.0 }
 0x4c5   :  { %665 = vadd.xlane.f32.xlu1 %v664_v60 }
 0x4c7   :  { %v2119_v61 = vpop.eup %2118 }
 0x4c8   :  { %v667_v62 = vsel %vm170_vm2, %v2119_v61, 0.0 }
 0x4c9   :  { %668 = vadd.xlane.f32.xlu1 %v667_v62 }
 0x4da   :  { %674 = vrot.lane.b32.xlu1 %v2324_v10, %s2241_s20 }
 0x4de   :  { %990 = vrot.lane.b32.xlu1 %v2324_v10, %s2243_s22 }
 0x4e2   :  { %1068 = vrot.lane.b32.xlu1 %v2327_v11, %s2243_s22 }
 0x4e6   :  { %1066 = vrot.lane.b32.xlu1 %v2327_v11, %s2242_s21 }
 0x54e   :  { %v666_v0 = vpop.xlane.xlu1 %665 }
 0x54f   :  { %2120 = vrcp.f32 %v666_v0 }
 0x552   :  { %v669_v1 = vpop.xlane.xlu1 %668 }
 0x553   :  { %2122 = vrcp.f32 %v669_v1 }
 0x556   :  { %v675_v3 = vpop.permute.xlu1 %674 }
 0x557   :  { %2020 = vmatpush3.msra.mxu0 %v675_v3 }
 0x558   :  { %2029 = vmatprep.subr.mxu0 %v164_v15 }
 0x55a   :  { %v991_v8 = vpop.permute.xlu1 %990 }
 0x55c   :  { %v2121_v4 = vpop.eup %2120 }
 0x55d   :  { %v672_v7 = vmul.f32 %v2121_v4, %v2117_v59 }
 0x55e   :  { %v1069_v13 = vpop.permute.xlu1 %1068 }
 0x55f   :  { %2022 = vmatmul.mubr.msk.f32.vlgmr.msra.gmra.mxu0 %vm170_vm2, %v672_v7 }
 0x560   :  { %v2123_v9 = vpop.eup %2122  ;;  %2030 = vmatpush3.msra.mxu0 %v164_v15 }
 0x561   :  { %v673_v12 = vmul.f32 %v2123_v9, %v2119_v61  ;;  %2039 = vmatprep.subr.mxu0 %v2235_v6 }
 0x562   :  { %v1067_v14 = vpop.permute.xlu1 %1066 }
 0x563   :  { %2027 = vmatmul.mubr.msk.f32.vlgmr.msra.gmra.mxu1 %vm170_vm2, %v673_v12 }
 0x564   :  { %2036 = vmatprep.mubr.msk.f32.mxu1 %vm170_vm2, %v416_v42  ;;  %2035 = vmatpush3.msra.mxu1 %v163_v63 }
 0x565   :  { %2044 = vmatprep.subr.mxu1 %v2235_v6 }
 0x567   :  { %2037 = vmatmul.mubr.msk.f32.vlgmr.msra.gmra.mxu1 %vm170_vm2, %v492_v44 }
 0x568   :  { %2045 = vmatpush3.xpose.msk.msra.mxu1 %vm170_vm2, %v1069_v13  ;;  %2046 = vmatprep.mubr.msk.f32.mxu1 %vm2236_vm1, %v2235_v6 }
 0x569   :  { %2054 = vmatprep.subr.mxu1 %v2235_v6 }
 0x56b   :  { %2047 = vmatmul.mubr.msk.f32.vlgmr.msra.gmra.mxu1 %vm170_vm2, %v1067_v14 }
 0x56c   :  { %2056 = vmatprep.mubr.msk.f32.mxu1 %vm2236_vm1, %v2235_v6 }
 0x61f   :  { %v746_v16 = vpop.f32.mrf.mxu0 }
 0x620   :  { %2031 = vmatprep.mubr.msk.f32.mxu0 %vm170_vm2, %v746_v16 }
 0x621   :  { %v2023_v17 = vpop.f32.mrf.mxu0 }
 0x623   :  { %v822_v18 = vpop.f32.mrf.mxu1 }
 0x624   :  { %2032 = vmatmul.mubr.msk.f32.vlgmr.msra.gmra.mxu0 %vm170_vm2, %v822_v18 }
 0x625   :  { %2040 = vmatpush3.xpose.msk.msra.mxu0 %vm170_vm2, %v991_v8  ;;  %v2028_v19 = vpop.f32.mrf.mxu1  ;;  %2041 = vmatprep.mubr.msk.f32.mxu0 %vm2236_vm1, %v2235_v6 }
 0x626   :  { %2049 = vmatprep.subr.mxu0 %v2235_v6 }
 0x627   :  { %v2399_v21 = vpop.f32.mrf.mxu1 }
 0x628   :  { %2042 = vmatmul.mubr.msk.f32.vlgmr.msra.gmra.mxu0 %vm170_vm2, %v989_v20 }
 0x629   :  { %v2402_v22 = vpop.f32.mrf.mxu1  ;;  %2051 = vmatprep.mubr.msk.f32.mxu0 %vm2236_vm1, %v2235_v6 }
 0x62b   :  { %v1140_v23 = vpop.f32.mrf.mxu1 }
 0x62c   :  { %v1147_v24 = vsel %vm170_vm2, %v1140_v23, -inf }
 0x62d   :  { %1148 = vmax.xlane.f32.xlu1 %v1147_v24  ;;  %v2048_v25 = vpop.f32.mrf.mxu1  ;;  %v166_v24 = vld [vmem:[#allocation7 + $0x18] sm:$0xff] }
 0x63e   :  { %1166 = vrot.lane.b32.xlu1 %v2324_v10, %s2244_s23 }
 0x642   :  { %1403 = vrot.lane.b32.xlu1 %v2324_v10, %s2245_s24 }
 0x646   :  { %1481 = vrot.lane.b32.xlu1 %v2327_v11, %s2245_s24 }
 0x64a   :  { %1479 = vrot.lane.b32.xlu1 %v2327_v11, %s2246_s25 }
 0x6b6   :  { %v1149_v26 = vpop.xlane.xlu1 %1148 }
 0x6b7   :  { %v1151_v28 = vsub.f32 %v1140_v23, %v1149_v26 }
 0x6b9   :  { %v1154_v29 = vmul.f32 1.442695, %v1151_v28 }
 0x6ba   :  { %v1167_v27 = vpop.permute.xlu1 %1166 }
 0x6bb   :  { %2050 = vmatpush3.msra.mxu0 %v1167_v27  ;;  %2124 = vpow2.f32 %v1154_v29 }
 0x6bc   :  { %2059 = vmatprep.subr.mxu0 %v165_v51 }
 0x6be   :  { %v1404_v47 = vpop.permute.xlu1 %1403 }
 0x6c2   :  { %v1482_v57 = vpop.permute.xlu1 %1481 }
 0x6c6   :  { %v1480_v60 = vpop.permute.xlu1 %1479 }
 0x6c8   :  { %v2125_v34 = vpop.eup %2124 }
 0x6c9   :  { %v1159_v36 = vsel %vm170_vm2, %v2125_v34, 0.0 }
 0x6e4   :  { %v2411_v30 = vpop.f32.mrf.mxu0 }
 0x6e5   :  { %v985_v3 = vadd.f32 %v2399_v21, %v2411_v30 }
 0x6e6   :  { %v2413_v31 = vpop.f32.mrf.mxu0 }
 0x6e7   :  { %v980_v7 = vadd.f32 %v2402_v22, %v2413_v31 }
 0x6e8   :  { %v1062_v32 = vpop.f32.mrf.mxu0 }
 0x6e9   :  { %v1144_v33 = vsel %vm170_vm2, %v1062_v32, -inf }
 0x6ea   :  { %1145 = vmax.xlane.f32.xlu0 %v1144_v33  ;;  %v2043_v35 = vpop.f32.mrf.mxu0 }
 0x6ee   :  { %1160 = vadd.xlane.f32.xlu0 %v1159_v36 }
 0x773   :  { %v1146_v37 = vpop.xlane.xlu0 %1145 }
 0x774   :  { %v1150_v38 = vsub.f32 %v1062_v32, %v1146_v37  ;;  %v1925_v32 = vld [vmem:[%s2481_s4] ss:$0 sm:$0xff] }
 0x776   :  { %v1152_v39 = vmul.f32 1.442695, %v1150_v38 }
 0x777   :  { %v1161_v42 = vpop.xlane.xlu0 %1160 }
 0x778   :  { %2126 = vpow2.f32 %v1152_v39 }
 0x779   :  { %2128 = vrcp.f32 %v1161_v42 }
 0x785   :  { %v2127_v40 = vpop.eup %2126 }
 0x786   :  { %v1156_v41 = vsel %vm170_vm2, %v2127_v40, 0.0  ;;  %v2129_v44 = vpop.eup %2128 }
 0x787   :  { %1157 = vadd.xlane.f32.xlu0 %v1156_v41  ;;  %v1165_v46 = vmul.f32 %v2129_v44, %v2125_v34 }
 0x79d   :  { %1242 = vrot.lane.b32.xlu0 %v2327_v11, %s2244_s23 }
 0x7a1   :  { %1401 = vrot.lane.b32.xlu0 %v2324_v10, %s2246_s25 }
 0x810   :  { %v1158_v43 = vpop.xlane.xlu0 %1157 }
 0x811   :  { %2130 = vrcp.f32 %v1158_v43 }
 0x814   :  { %v1243_v45 = vpop.permute.xlu0 %1242 }
 0x815   :  { %2055 = vmatpush3.msra.mxu1 %v1243_v45 }
 0x816   :  { %2057 = vmatmul.mubr.msk.f32.vlgmr.msra.gmra.mxu1 %vm170_vm2, %v1165_v46  ;;  %2064 = vmatprep.subr.mxu1 %v2235_v6 }
 0x817   :  { %2065 = vmatpush3.xpose.msk.msra.mxu1 %vm170_vm2, %v1404_v47  ;;  %2066 = vmatprep.mubr.msk.f32.mxu1 %vm2236_vm1, %v2235_v6 }
 0x818   :  { %v1402_v48 = vpop.permute.xlu0 %1401  ;;  %2074 = vmatprep.subr.mxu1 %v2235_v6 }
 0x81a   :  { %2067 = vmatmul.mubr.msk.f32.vlgmr.msra.gmra.mxu1 %vm170_vm2, %v1402_v48 }
 0x81b   :  { %2076 = vmatprep.mubr.msk.f32.mxu1 %vm2236_vm1, %v2235_v6 }
 0x81e   :  { %v2131_v49 = vpop.eup %2130 }
 0x81f   :  { %v1164_v50 = vmul.f32 %v2131_v49, %v2127_v40 }
 0x821   :  { %2052 = vmatmul.mubr.msk.f32.vlgmr.msra.gmra.mxu0 %vm170_vm2, %v1164_v50 }
 0x822   :  { %2060 = vmatpush3.msra.mxu0 %v165_v51 }
 0x823   :  { %2069 = vmatprep.subr.mxu0 %v2235_v6 }
 0x8d6   :  { %v1314_v52 = vpop.f32.mrf.mxu1 }
 0x8d8   :  { %v2058_v53 = vpop.f32.mrf.mxu1 }
 0x8da   :  { %v1475_v54 = vpop.f32.mrf.mxu1 }
 0x8db   :  { %v1557_v55 = vsel %vm170_vm2, %v1475_v54, -inf }
 0x8dc   :  { %1558 = vmax.xlane.f32.xlu0 %v1557_v55  ;;  %v2068_v56 = vpop.f32.mrf.mxu1 }
 0x8e1   :  { %v1238_v58 = vpop.f32.mrf.mxu0 }
 0x8e2   :  { %2061 = vmatprep.mubr.msk.f32.mxu0 %vm170_vm2, %v1238_v58 }
 0x8e3   :  { %v2053_v59 = vpop.f32.mrf.mxu0  ;;  %2062 = vmatmul.mubr.msk.f32.vlgmr.msra.gmra.mxu0 %vm170_vm2, %v1314_v52 }
 0x8e4   :  { %2070 = vmatpush3.xpose.msk.msra.mxu0 %vm170_vm2, %v1482_v57  ;;  %2071 = vmatprep.mubr.msk.f32.mxu0 %vm2236_vm1, %v2235_v6  ;;  %v1926_v57 = vld [vmem:[%s2482_s5] ss:$0 sm:$0xff] }
 0x8e5   :  { %2079 = vmatprep.subr.mxu0 %v2235_v6 }
 0x8e7   :  { %2072 = vmatmul.mubr.msk.f32.vlgmr.msra.gmra.mxu0 %vm170_vm2, %v1480_v60  ;;  %v1927_v60 = vld [vmem:[%s2483_s6] ss:$0 sm:$0xff] }
 0x8e8   :  { %2081 = vmatprep.mubr.msk.f32.mxu0 %vm2236_vm1, %v2235_v6 }
 0x965   :  { %v1559_v61 = vpop.xlane.xlu0 %1558 }
 0x966   :  { %v1563_v62 = vsub.f32 %v1475_v54, %v1559_v61 }
 0x968   :  { %v1565_v63 = vmul.f32 1.442695, %v1563_v62 }
 0x96a   :  { %2132 = vpow2.f32 %v1565_v63 }
 0x977   :  { %v2133_v0 = vpop.eup %2132 }
 0x978   :  { %v1569_v1 = vsel %vm170_vm2, %v2133_v0, 0.0 }
 0x979   :  { %1570 = vadd.xlane.f32.xlu0 %v1569_v1 }
 0x9a3   :  { %v2063_v4 = vpop.f32.mrf.mxu0 }
 0x9a4   :  { %v1400_v8 = vadd.f32 %v2063_v4, %v985_v3 }
 0x9a5   :  { %v1390_v9 = vpop.f32.mrf.mxu0 }
 0x9a6   :  { %v1399_v12 = vadd.f32 %v1390_v9, %v980_v7 }
 0x9a7   :  { %v1553_v13 = vpop.f32.mrf.mxu0 }
 0x9a8   :  { %v1560_v6 = vsel %vm170_vm2, %v1553_v13, -inf }
 0x9a9   :  { %1561 = vmax.xlane.f32.xlu1 %v1560_v6  ;;  %v2073_v14 = vpop.f32.mrf.mxu0 }
 0x9ba   :  { %1579 = vrot.lane.b32.xlu1 %v2324_v10, %s2247_s26 }
 0xa02   :  { %v1571_v15 = vpop.xlane.xlu0 %1570 }
 0xa03   :  { %2134 = vrcp.f32 %v1571_v15 }
 0xa10   :  { %v2135_v17 = vpop.eup %2134 }
 0xa11   :  { %v1577_v21 = vmul.f32 %v2135_v17, %v2133_v0 }
 0xa32   :  { %v1562_v16 = vpop.xlane.xlu1 %1561 }
 0xa33   :  { %v1564_v18 = vsub.f32 %v1553_v13, %v1562_v16 }
 0xa35   :  { %v1567_v19 = vmul.f32 1.442695, %v1564_v18 }
 0xa36   :  { %v1580_v20 = vpop.permute.xlu1 %1579 }
 0xa37   :  { %2136 = vpow2.f32 %v1567_v19  ;;  %2075 = vmatpush3.msra.mxu1 %v1580_v20 }
 0xa38   :  { %2077 = vmatmul.mubr.msk.f32.vlgmr.msra.gmra.mxu1 %vm170_vm2, %v1577_v21  ;;  %2084 = vmatprep.subr.mxu1 %v166_v24 }
 0xa39   :  { %2085 = vmatpush3.msra.mxu1 %v166_v24 }
 0xa44   :  { %v2137_v22 = vpop.eup %2136 }
 0xa45   :  { %v1572_v23 = vsel %vm170_vm2, %v2137_v22, 0.0 }
 0xa46   :  { %1573 = vadd.xlane.f32.xlu0 %v1572_v23 }
 0xa5c   :  { %1655 = vrot.lane.b32.xlu0 %v2327_v11, %s2247_s26 }
 0xacf   :  { %v1574_v10 = vpop.xlane.xlu0 %1573 }
 0xad0   :  { %2138 = vrcp.f32 %v1574_v10 }
 0xad3   :  { %v1656_v25 = vpop.permute.xlu0 %1655 }
 0xad4   :  { %2080 = vmatpush3.msra.mxu0 %v1656_v25 }
 0xadd   :  { %v2139_v26 = vpop.eup %2138 }
 0xade   :  { %v1578_v27 = vmul.f32 %v2139_v26, %v2137_v22 }
 0xae0   :  { %2082 = vmatmul.mubr.msk.f32.vlgmr.msra.gmra.mxu0 %vm170_vm2, %v1578_v27 }
 0xaf8   :  { %v1651_v28 = vpop.f32.mrf.mxu1 }
 0xaf9   :  { %2086 = vmatprep.mubr.msk.f32.mxu1 %vm170_vm2, %v1651_v28 }
 0xafa   :  { %v2078_v29 = vpop.f32.mrf.mxu1 }
 0xba0   :  { %v1727_v30 = vpop.f32.mrf.mxu0 }
 0xba1   :  { %2087 = vmatmul.mubr.msk.f32.vlgmr.msra.gmra.mxu1 %vm170_vm2, %v1727_v30 }
 0xba2   :  { %v2083_v31 = vpop.f32.mrf.mxu0 }
 0xc61   :  { %v2088_v11 = vpop.f32.mrf.mxu1 }
 0xc62   :  { %v1813_v33 = vadd.f32 %v2088_v11, %v1400_v8 }
 0xc63   :  { %v1803_v34 = vpop.f32.mrf.mxu1 }
 0xc64   :  { %v1822_v35 = vadd.f32 %v1925_v32, %v1813_v33  ;;  %v1812_v36 = vadd.f32 %v1803_v34, %v1399_v12 }
 0xc66   :  { %v1821_v37 = vadd.f32 %v1925_v32, %v1812_v36  ;;  %v1824_v38 = vadd.f32 %v1822_v35, %v2311_v5 }
 0xc68   :  { %v1828_v39 = vsel %vm81_vm0, %v1824_v38, 0.0  ;;  %v1823_v40 = vadd.f32 %v1821_v37, %v2307_v2 }
 0xc69   :  { %1829 = vadd.xlane.f32.xlu0 %v1828_v39 }
 0xc6a   :  { %v1825_v41 = vsel %vm81_vm0, %v1823_v40, 0.0 }
 0xc6b   :  { %1826 = vadd.xlane.f32.xlu1 %v1825_v41 }
 0xcf2   :  { %v1830_v42 = vpop.xlane.xlu0 %1829 }
 0xcf3   :  { %v1833_v43 = vmul.f32 0.03125, %v1830_v42 }
 0xcf4   :  { %v1827_v44 = vpop.xlane.xlu1 %1826 }
 0xcf5   :  { %v1835_v45 = vsub.f32 %v1824_v38, %v1833_v43  ;;  %v1832_v46 = vmul.f32 0.03125, %v1827_v44 }
 0xcf7   :  { %v1834_v47 = vsub.f32 %v1823_v40, %v1832_v46  ;;  %v1837_v48 = vmul.f32 %v1835_v45, %v1835_v45 }
 0xcf9   :  { %v1841_v49 = vsel %vm81_vm0, %v1837_v48, 0.0  ;;  %v1836_v50 = vmul.f32 %v1834_v47, %v1834_v47 }
 0xcfa   :  { %1842 = vadd.xlane.f32.xlu0 %v1841_v49 }
 0xcfb   :  { %v1838_v5 = vsel %vm81_vm0, %v1836_v50, 0.0 }
 0xcfc   :  { %1839 = vadd.xlane.f32.xlu1 %v1838_v5 }
 0xd83   :  { %v1843_v51 = vpop.xlane.xlu0 %1842 }
 0xd84   :  { %v1845_v2 = vmul.f32 0.03125, %v1843_v51 }
 0xd85   :  { %v1840_v52 = vpop.xlane.xlu1 %1839 }
 0xd86   :  { %v1847_v53 = vadd.f32 1e-05, %v1845_v2  ;;  %v1844_v54 = vmul.f32 0.03125, %v1840_v52 }
 0xd88   :  { %2140 = vrsqrt.f32 %v1847_v53  ;;  %v1846_v55 = vadd.f32 1e-05, %v1844_v54 }
 0xd8a   :  { %2142 = vrsqrt.f32 %v1846_v55 }
 0xd95   :  { %v2141_v56 = vpop.eup %2140 }
 0xd96   :  { %v1851_v58 = vmul.f32 %v2141_v56, %v1835_v45 }
 0xd97   :  { %v2143_v59 = vpop.eup %2142 }
 0xd98   :  { %v1850_v61 = vmul.f32 %v2143_v59, %v1834_v47  ;;  %v1860_v62 = vmul.f32 %v1926_v57, %v1851_v58 }
 0xd9a   :  { %v1859_v63 = vmul.f32 %v1926_v57, %v1850_v61  ;;  %v1869_v0 = vadd.f32 %v1927_v60, %v1860_v62 }
 0xd9c   :  { %v1868_v1 = vadd.f32 %v1927_v60, %v1859_v63  ;;  %1871 = vst.msk [vmem:[#allocation8 + $0x8] sm:$0xff] %vm81_vm0, %v1869_v0 }
 0xd9e   :  { %1870 = vst.msk [vmem:[#allocation8] sm:$0xff] %vm81_vm0, %v1868_v1 }
 0xd9f   :  { %2215 = shalt.err (!%p2212_p5)
}
 0xda0   :  { %1883 = dma.vmem_to_hbm [thread:$0]  %s1878_s12, 256, %s2484_s7, [#allocation4], %s2232_s29, %s2232_s29, %s2233_s30  }
 0xda1   :  { %2228 = dma.done.wait [#allocation4], 256  }
 0xda2   :  { %2229 = vsyncadd [#allocation4], 4294967040 }
 0xda3   :  { %1887 = vsyncpa [#allocation3], 1 }
 0xda4   :  { %1888 = vsyncpa [#allocation6], 1 }
 0xda5   :  { %1889 = vsyncpa [#allocation4], 1 }

</bundles_post_ra>
